<compile_context>
chip_gen: v6e
topology: v6e:2x2x1
jax: 0.10.0
libtpu: 0.0.40
codegen_flags: <defaults>
</compile_context>

<pallas_src>
import jax
import jax.numpy as jnp
from jax.experimental import pallas as pl
from jax.experimental.pallas import tpu as pltpu

Y_SIZE = 16                        # y_size global in the original script
OUT_DIM = Y_SIZE * Y_SIZE          # 256
ENCODED_SPACE_DIM = 8
LAYER_DIMS = [ENCODED_SPACE_DIM, 64, 128, 256, OUT_DIM]
N_LAYERS = len(LAYER_DIMS) - 1     # 4 linear layers
D_PAD = 256                        # every hidden/output activation padded to 256 lanes


def _cdiv(a, b):
    return (a + b - 1) // b


def _round_up(n, m):
    return _cdiv(n, m) * m


def _decoder_kernel(x_ref, w1_ref, wpk_ref, bpk_ref, o_ref):
    """Fused MLP: 4 Linear layers, ReLU after the first three, Sigmoid at the end.

    x_ref  : (tile, 8)        f32
    w1_ref : (8, 256)         bf16  (cols >= 64 are zeros)
    wpk_ref: (3, 256, 256)    bf16  (zero-padded layers 2..4)
    bpk_ref: (4, 1, 256)      f32   (zero-padded biases)
    o_ref  : (tile, 256)      out_dtype
    """
    # Layer 1: (tile, 8) @ (8, 256) on the MXU with f32 accumulation.
    h = jnp.dot(x_ref[...].astype(jnp.bfloat16), w1_ref[...],
                preferred_element_type=jnp.float32) + bpk_ref[0]
    h = jnp.maximum(h, 0.0)                                  # ReLU (VPU)

    # Layers 2..4: uniform (tile, 256) @ (256, 256); padding lanes stay exactly 0.
    for layer in range(N_LAYERS - 1):                        # static unroll (3 iters)
        h = jnp.dot(h.astype(jnp.bfloat16), wpk_ref[layer],
                    preferred_element_type=jnp.float32) + bpk_ref[layer + 1]
        if layer < N_LAYERS - 2:
            h = jnp.maximum(h, 0.0)                          # ReLU (VPU)

    # Sigmoid epilogue: exp and approx reciprocal both go to the EUP slot,
    # freeing VALU bandwidth vs an exact f32 divide.
    o_ref[...] = pl.reciprocal(1.0 + jnp.exp(-h), approx=True).astype(o_ref.dtype)


def decoder_synt_forward(x, packed_params, *, batch_tile=None,
                         out_dtype=jnp.float32):
    """x: (B, ENCODED_SPACE_DIM) float32.

    packed_params: (w1, wpk, bpk) from pack_params().
    out_dtype: float32 (default, matches PyTorch) or bfloat16 (halves output
               writeback bytes -- useful on v5e at large B).
    """
    w1p, wpk, bpk = packed_params
    B, d_in = x.shape
    assert d_in == ENCODED_SPACE_DIM

    # f32 output needs 8-row alignment; sub-32-bit outputs want 16.
    row_align = 8 if jnp.dtype(out_dtype).itemsize >= 4 else 16

    if batch_tile is None:
        if B <= 1024:
            # Single grid step: per-step overhead (~0.35 us) dominates this
            # weight-resident MLP; zero reuse benefit from extra steps on
            # 1-TC chips (v5e/v6e).
            batch_tile = _round_up(max(B, row_align), row_align)
        else:
            # Steps of <= 1024 rows: large lane-dense output DMAs near the HBM
            # roofline, >= 2 steps so dimension_semantics=("parallel",) shards
            # across v7x's two TensorCores, and the tile is sized to keep
            # batch padding to < one alignment quantum per step.
            n_steps = _cdiv(B, 1024)
            batch_tile = _round_up(_cdiv(B, n_steps), row_align)

    B_pad = _round_up(B, batch_tile)
    if B_pad != B:
        x = jnp.pad(x, ((0, B_pad - B), (0, 0)))

    out = pl.pallas_call(
        _decoder_kernel,
        out_shape=jax.ShapeDtypeStruct((B_pad, D_PAD), out_dtype),
        grid_spec=pltpu.PrefetchScalarGridSpec(
            num_scalar_prefetch=0,
            grid=(B_pad // batch_tile,),
            in_specs=[
                pl.BlockSpec((batch_tile, ENCODED_SPACE_DIM), lambda i: (i, 0)),
                # Whole packed weights/biases resident in VMEM (grid-invariant
                # index maps); total footprint ~0.4 MiB, double-buffered < 1 MiB.
                pl.BlockSpec(w1p.shape, lambda i: (0, 0)),
                pl.BlockSpec(wpk.shape, lambda i: (0, 0, 0)),
                pl.BlockSpec(bpk.shape, lambda i: (0, 0, 0)),
            ],
            out_specs=pl.BlockSpec((batch_tile, D_PAD), lambda i: (i, 0)),
        ),
        compiler_params=pltpu.CompilerParams(
            dimension_semantics=("parallel",),
            # Explicit but generous; the kernel is nowhere near VMEM-bound on
            # any generation (<= ~4 MiB even at tile=1024), so tiles are chosen
            # for overhead/megacore occupancy, not capacity.
            vmem_limit_bytes=32 * 1024 * 1024,
        ),
    )(x, w1p, wpk, bpk)
    return out[:B]


def init_params(key):
    """PyTorch-style init U(-1/sqrt(fan_in), 1/sqrt(fan_in)).

    Returns per-layer (W (in,out) f32, b (out,) f32) at the true (unpadded) dims.
    """
    params = []
    for layer in range(N_LAYERS):
        d_in, d_out = LAYER_DIMS[layer], LAYER_DIMS[layer + 1]
        key, kw, kb = jax.random.split(key, 3)
        bound = 1.0 / (d_in ** 0.5)
        w = jax.random.uniform(kw, (d_in, d_out), jnp.float32, -bound, bound)
        b = jax.random.uniform(kb, (d_out,), jnp.float32, -bound, bound)
        params.append((w, b))
    return params


def pack_params(params):
    """Pack the 4 layers into 3 lane-dense, DMA-friendly arrays.

    Zero padding is exact: padded activation lanes are 0 (bias pad = 0,
    ReLU(0) = 0) and padded weight rows/cols contribute exactly 0.
    """
    (w1, _), (w2, _), (w3, _), (w4, _) = params

    w1p = jnp.zeros((ENCODED_SPACE_DIM, D_PAD), jnp.float32)
    w1p = w1p.at[:, :w1.shape[1]].set(w1)

    wpk = jnp.zeros((N_LAYERS - 1, D_PAD, D_PAD), jnp.float32)
    wpk = wpk.at[0, :w2.shape[0], :w2.shape[1]].set(w2)
    wpk = wpk.at[1, :w3.shape[0], :w3.shape[1]].set(w3)
    wpk = wpk.at[2, :w4.shape[0], :w4.shape[1]].set(w4)

    bpk = jnp.zeros((N_LAYERS, 1, D_PAD), jnp.float32)
    for i, (_, b) in enumerate(params):
        bpk = bpk.at[i, 0, :b.shape[0]].set(b)

    return w1p.astype(jnp.bfloat16), wpk.astype(jnp.bfloat16), bpk


def reference_forward(x, params):
    """Pure-JAX reference with the kernel's bf16-weight / f32-accumulate numerics."""
    h = x
    for layer, (w, b) in enumerate(params):
        h = jnp.dot(h.astype(jnp.bfloat16), w.astype(jnp.bfloat16),
                    preferred_element_type=jnp.float32) + b
        if layer < N_LAYERS - 1:
            h = jnp.maximum(h, 0.0)
    return 1.0 / (1.0 + jnp.exp(-h))


if __name__ == "__main__":
    key = jax.random.PRNGKey(0)
    kx, kp = jax.random.split(key)

    B = 16
    x = jax.random.normal(kx, (B, ENCODED_SPACE_DIM), dtype=jnp.float32)
    params = init_params(kp)
    packed = pack_params(params)

    out = decoder_synt_forward(x, packed)
    out = jax.block_until_ready(out)

    ref = reference_forward(x, params)
    assert out.shape == (B, OUT_DIM), out.shape
    # Tolerance covers bf16 weights + the approx-reciprocal sigmoid epilogue.
    assert jnp.allclose(out, ref, atol=2e-3, rtol=2e-3), "mismatch vs reference"

    print("KERNEL_OK")
</pallas_src>

<mosaic_0001>
module attributes {stable_mosaic.version = 11 : i64} {
  func.func @_decoder_kernel(%arg0: i32, %arg1: memref<16x8xf32, #tpu.memory_space<vmem>>, %arg2: memref<8x256xbf16, #tpu.memory_space<vmem>>, %arg3: memref<3x256x256xbf16, #tpu.memory_space<vmem>>, %arg4: memref<4x1x256xf32, #tpu.memory_space<vmem>>, %arg5: memref<16x256xf32, #tpu.memory_space<vmem>>) attributes {dimension_semantics = [#tpu.dimension_semantics<parallel>], iteration_bounds = array<i64: 1>, scalar_prefetch = 0 : i64, scratch_operands = 0 : i64, tpu.core_type = #tpu.core_type<tc>, window_params = [{transform_indices = @transform_0, window_bounds = array<i64: 16, 8>}, {pipeline_mode = #tpu.pipeline_mode<synchronous>, transform_indices = @transform_1, window_bounds = array<i64: 8, 256>}, {pipeline_mode = #tpu.pipeline_mode<synchronous>, transform_indices = @transform_2, window_bounds = array<i64: 3, 256, 256>}, {pipeline_mode = #tpu.pipeline_mode<synchronous>, transform_indices = @transform_3, window_bounds = array<i64: 4, 1, 256>}, {transform_indices = @transform_4, window_bounds = array<i64: 16, 256>}]} {
    %c0 = arith.constant 0 : index
    %c0_0 = arith.constant 0 : index
    %0 = vector.load %arg1[%c0, %c0_0] : memref<16x8xf32, #tpu.memory_space<vmem>>, vector<16x8xf32>
    %1 = arith.truncf %0 : vector<16x8xf32> to vector<16x8xbf16>
    %c0_1 = arith.constant 0 : index
    %c0_2 = arith.constant 0 : index
    %2 = vector.load %arg2[%c0_1, %c0_2] : memref<8x256xbf16, #tpu.memory_space<vmem>>, vector<8x256xbf16>
    %cst = arith.constant dense<0.000000e+00> : vector<16x256xf32>
    %3 = tpu.matmul %1, %2, %cst {dimension_numbers = #tpu.dot_dimension_numbers<[1], [0], [0], [1], [0, 0, 1, 1], [], []>} : vector<16x8xbf16>, vector<8x256xbf16>, vector<16x256xf32> -> vector<16x256xf32>
    %c0_3 = arith.constant 0 : index
    %c0_4 = arith.constant 0 : index
    %c0_5 = arith.constant 0 : index
    %4 = vector.load %arg4[%c0_3, %c0_4, %c0_5] : memref<4x1x256xf32, #tpu.memory_space<vmem>>, vector<1x1x256xf32>
    %5 = vector.shape_cast %4 : vector<1x1x256xf32> to vector<1x256xf32>
    %6 = vector.broadcast %5 : vector<1x256xf32> to vector<16x256xf32>
    %7 = arith.addf %3, %6 : vector<16x256xf32>
    %cst_6 = arith.constant 0.000000e+00 : f32
    %8 = vector.broadcast %cst_6 : f32 to vector<16x256xf32>
    %9 = arith.maximumf %7, %8 : vector<16x256xf32>
    %10 = arith.truncf %9 : vector<16x256xf32> to vector<16x256xbf16>
    %c0_7 = arith.constant 0 : index
    %c0_8 = arith.constant 0 : index
    %c0_9 = arith.constant 0 : index
    %11 = vector.load %arg3[%c0_7, %c0_8, %c0_9] : memref<3x256x256xbf16, #tpu.memory_space<vmem>>, vector<1x256x256xbf16>
    %12 = vector.shape_cast %11 : vector<1x256x256xbf16> to vector<256x256xbf16>
    %cst_10 = arith.constant dense<0.000000e+00> : vector<16x256xf32>
    %13 = tpu.matmul %10, %12, %cst_10 {dimension_numbers = #tpu.dot_dimension_numbers<[1], [0], [0], [1], [0, 0, 1, 1], [], []>} : vector<16x256xbf16>, vector<256x256xbf16>, vector<16x256xf32> -> vector<16x256xf32>
    %c1 = arith.constant 1 : index
    %c0_11 = arith.constant 0 : index
    %c0_12 = arith.constant 0 : index
    %14 = vector.load %arg4[%c1, %c0_11, %c0_12] : memref<4x1x256xf32, #tpu.memory_space<vmem>>, vector<1x1x256xf32>
    %15 = vector.shape_cast %14 : vector<1x1x256xf32> to vector<1x256xf32>
    %16 = vector.broadcast %15 : vector<1x256xf32> to vector<16x256xf32>
    %17 = arith.addf %13, %16 : vector<16x256xf32>
    %cst_13 = arith.constant 0.000000e+00 : f32
    %18 = vector.broadcast %cst_13 : f32 to vector<16x256xf32>
    %19 = arith.maximumf %17, %18 : vector<16x256xf32>
    %20 = arith.truncf %19 : vector<16x256xf32> to vector<16x256xbf16>
    %c1_14 = arith.constant 1 : index
    %c0_15 = arith.constant 0 : index
    %c0_16 = arith.constant 0 : index
    %21 = vector.load %arg3[%c1_14, %c0_15, %c0_16] : memref<3x256x256xbf16, #tpu.memory_space<vmem>>, vector<1x256x256xbf16>
    %22 = vector.shape_cast %21 : vector<1x256x256xbf16> to vector<256x256xbf16>
    %cst_17 = arith.constant dense<0.000000e+00> : vector<16x256xf32>
    %23 = tpu.matmul %20, %22, %cst_17 {dimension_numbers = #tpu.dot_dimension_numbers<[1], [0], [0], [1], [0, 0, 1, 1], [], []>} : vector<16x256xbf16>, vector<256x256xbf16>, vector<16x256xf32> -> vector<16x256xf32>
    %c2 = arith.constant 2 : index
    %c0_18 = arith.constant 0 : index
    %c0_19 = arith.constant 0 : index
    %24 = vector.load %arg4[%c2, %c0_18, %c0_19] : memref<4x1x256xf32, #tpu.memory_space<vmem>>, vector<1x1x256xf32>
    %25 = vector.shape_cast %24 : vector<1x1x256xf32> to vector<1x256xf32>
    %26 = vector.broadcast %25 : vector<1x256xf32> to vector<16x256xf32>
    %27 = arith.addf %23, %26 : vector<16x256xf32>
    %cst_20 = arith.constant 0.000000e+00 : f32
    %28 = vector.broadcast %cst_20 : f32 to vector<16x256xf32>
    %29 = arith.maximumf %27, %28 : vector<16x256xf32>
    %30 = arith.truncf %29 : vector<16x256xf32> to vector<16x256xbf16>
    %c2_21 = arith.constant 2 : index
    %c0_22 = arith.constant 0 : index
    %c0_23 = arith.constant 0 : index
    %31 = vector.load %arg3[%c2_21, %c0_22, %c0_23] : memref<3x256x256xbf16, #tpu.memory_space<vmem>>, vector<1x256x256xbf16>
    %32 = vector.shape_cast %31 : vector<1x256x256xbf16> to vector<256x256xbf16>
    %cst_24 = arith.constant dense<0.000000e+00> : vector<16x256xf32>
    %33 = tpu.matmul %30, %32, %cst_24 {dimension_numbers = #tpu.dot_dimension_numbers<[1], [0], [0], [1], [0, 0, 1, 1], [], []>} : vector<16x256xbf16>, vector<256x256xbf16>, vector<16x256xf32> -> vector<16x256xf32>
    %c3 = arith.constant 3 : index
    %c0_25 = arith.constant 0 : index
    %c0_26 = arith.constant 0 : index
    %34 = vector.load %arg4[%c3, %c0_25, %c0_26] : memref<4x1x256xf32, #tpu.memory_space<vmem>>, vector<1x1x256xf32>
    %35 = vector.shape_cast %34 : vector<1x1x256xf32> to vector<1x256xf32>
    %36 = vector.broadcast %35 : vector<1x256xf32> to vector<16x256xf32>
    %37 = arith.addf %33, %36 : vector<16x256xf32>
    %cst_27 = arith.constant 0.000000e+00 : f32
    %38 = vector.broadcast %cst_27 : f32 to vector<16x256xf32>
    %39 = arith.subf %38, %37 : vector<16x256xf32>
    %40 = math.exp %39 : vector<16x256xf32>
    %cst_28 = arith.constant 1.000000e+00 : f32
    %41 = vector.broadcast %cst_28 : f32 to vector<16x256xf32>
    %42 = arith.addf %41, %40 : vector<16x256xf32>
    %43 = tpu.reciprocal %42 {approx = true} : vector<16x256xf32> -> vector<16x256xf32>
    %c0_29 = arith.constant 0 : index
    %c0_30 = arith.constant 0 : index
    %44 = vector.load %arg5[%c0_29, %c0_30] : memref<16x256xf32, #tpu.memory_space<vmem>>, vector<16x256xf32>
    tpu.vector_store %arg5[%c0_29, %c0_30], %43 {strides = array<i32>} : memref<16x256xf32, #tpu.memory_space<vmem>>, vector<16x256xf32>,
    return
  }
  func.func @transform_0(%arg0: i32) -> (i32, i32) {
    %c0_i32 = arith.constant 0 : i32
    %c0_i32_0 = arith.constant 0 : i32
    return %arg0, %c0_i32 : i32, i32
  }
  func.func @transform_1(%arg0: i32) -> (i32, i32) {
    %c0_i32 = arith.constant 0 : i32
    %c0_i32_0 = arith.constant 0 : i32
    %c0_i32_1 = arith.constant 0 : i32
    return %c0_i32, %c0_i32_0 : i32, i32
  }
  func.func @transform_2(%arg0: i32) -> (i32, i32, i32) {
    %c0_i32 = arith.constant 0 : i32
    %c0_i32_0 = arith.constant 0 : i32
    %c0_i32_1 = arith.constant 0 : i32
    %c0_i32_2 = arith.constant 0 : i32
    return %c0_i32, %c0_i32_0, %c0_i32_1 : i32, i32, i32
  }
  func.func @transform_3(%arg0: i32) -> (i32, i32, i32) {
    %c0_i32 = arith.constant 0 : i32
    %c0_i32_0 = arith.constant 0 : i32
    %c0_i32_1 = arith.constant 0 : i32
    %c0_i32_2 = arith.constant 0 : i32
    return %c0_i32, %c0_i32_0, %c0_i32_1 : i32, i32, i32
  }
  func.func @transform_4(%arg0: i32) -> (i32, i32) {
    %c0_i32 = arith.constant 0 : i32
    %c0_i32_0 = arith.constant 0 : i32
    return %arg0, %c0_i32 : i32, i32
  }
}

</mosaic_0001>

<bundles_post_ra>
// kernel: tpu_custom_call.1
= control target key start
LH: loop header
LB: loop body
LE: loop exit
PB: predicated region body
PF: predicated region fallthrough
CT: control target
= control target key end

     0   :  { %9 = vsyncpa [#allocation3], 0  ;;  %s1300_s0 = inlined_call_operand.vmem [shape: f32[16,8], index: 0, kind: input, shape index: {}]   ;;  %s1301_s1 = inlined_call_operand.vmem [shape: bf16[8,256], index: 1, kind: input, shape index: {}]   ;;  %s1302_s2 = inlined_call_operand.hbm [shape: bf16[3,256,256], index: 2, kind: input, shape index: {}]   ;;  %s1303_s3 = inlined_call_operand.vmem [shape: f32[4,1,256], index: 3, kind: input, shape index: {}]   ;;  %s1304_s4 = inlined_call_operand.hbm [shape: f32[16,256], index: 4, kind: output, shape index: {}]  }
   0x1   :  { %10 = vsyncpa [#allocation4], 0  ;;  %s1229_s15 = smov [#allocation2]  }
   0x2   :  { %s20_s16 = sshll.u32 %s1229_s15, 4  ;;  %s21_s16 = int_to_ptr.vmem [resolvable:$true] %s20_s16 }
   0x3   :  { %s1193_s17 = scalar_lea.vmem %s21_s16, 12288  ;;  %p1198_p1 = scmp.lt.s32.totalorder %s21_s16, %s21_s16 }
   0x4   :  { %p1194_p0 = scmp.ne.s32.totalorder %s21_s16, %s1193_s17  ;;  %p1199_p2 = scmp.lt.s32.totalorder %s1193_s17, %s1193_s17 }
   0x6   :  { %p1200_p3 = por %p1199_p2, %p1198_p1 }
   0x8   :  { %p1201_p4 = pnand %p1200_p3, %p1194_p0 }
   0xa   :  { %1204 = shalt.err (!%p1201_p4)
}
   0xb   :  { %s1230_s18 = smov 128   ;;  %s1231_s19 = smov 8  }
   0xc   :  { %26 = dma.hbm_to_vmem [thread:$0]  %s1302_s2, 12288, %s21_s16, [#allocation3], %s1230_s18, %s1230_s18, %s1231_s19  }
   0xd   :  { %1225 = dma.done.wait [#allocation3], 12288  }
   0xe   :  { %1226 = vsyncadd [#allocation3], 4294955008  ;;  %v1232_v0 = vmov 0   ;;  %v36_v1 = vld [vmem:[%s1301_s1] sm:$0xff]  ;;  %vm58_vm0 = vcmask 1043456   ;;  %v34_v3 = vld [vmem:[%s1300_s0 + $0x8] sm:$0xff] }
   0xf   :  { %97 = vmatprep.mubr.bf16.mxu0 %v1232_v0  ;;  %v33_v2 = vld [vmem:[%s1300_s0] sm:$0xff]  ;;  %v914_v4 = vcombine.high %v36_v1, %v36_v1  ;;  %v913_v5 = vcombine.low %v36_v1, %v36_v1  ;;  %v1025_v6 = vld [vmem:[#allocation2 + $0x74] ss:$8 sps:$4 sm:$0xff]   ;;  %v1027_v7 = vld [vmem:[#allocation2 + $0x70] ss:$8 sps:$4 sm:$0xff]   ;;  %vm54_vm1 = vcmask 64512  }
  0x10   :  { %v35_v9 = vpack.c.bf16 %v34_v3, %v33_v2  ;;  %319 = vmatprep.subr.bf16.mxu1 %v1025_v6  ;;  %v1028_v10 = vld [vmem:[#allocation2 + $0x64] ss:$8 sps:$4 sm:$0xff]   ;;  %v1030_v11 = vld [vmem:[#allocation2 + $0x60] ss:$8 sps:$4 sm:$0xff]   ;;  %v1031_v12 = vld [vmem:[#allocation2 + $0x54] ss:$8 sps:$4 sm:$0xff]   ;;  %v39_v2 = vlaneseq }
  0x11   :  { %915 = vmatprep.subr.msk.bf16.mxu0 %vm58_vm0, %v914_v4  ;;  %v60_v8 = vsel %vm58_vm0, %v913_v5, 0  ;;  %320 = vmatpush1.bf16.msra.mxu1 %v1027_v7  ;;  %v1033_v13 = vld [vmem:[#allocation2 + $0x50] ss:$8 sps:$4 sm:$0xff]   ;;  %v1034_v14 = vld [vmem:[#allocation2 + $0x44] ss:$8 sps:$4 sm:$0xff]  }
  0x12   :  { %80 = vmatpush1.bf16.msra.mxu0 %v60_v8  ;;  %321 = vmatprep.subr.bf16.mxu1 %v1028_v10  ;;  %v1036_v15 = vld [vmem:[#allocation2 + $0x40] ss:$8 sps:$4 sm:$0xff]   ;;  %v1037_v16 = vld [vmem:[#allocation2 + $0x34] ss:$8 sps:$4 sm:$0xff]   ;;  %v1039_v17 = vld [vmem:[#allocation2 + $0x30] ss:$8 sps:$4 sm:$0xff]  }
  0x13   :  { %v1040_v18 = vld [vmem:[#allocation2 + $0x24] ss:$8 sps:$4 sm:$0xff]   ;;  %v1042_v19 = vld [vmem:[#allocation2 + $0x20] ss:$8 sps:$4 sm:$0xff]   ;;  %v1043_v20 = vld [vmem:[#allocation2 + $0x14] ss:$8 sps:$4 sm:$0xff]  }
  0x14   :  { %v1045_v21 = vld [vmem:[#allocation2 + $0x10] ss:$8 sps:$4 sm:$0xff]   ;;  %v1046_v22 = vld [vmem:[#allocation2 + $0x4] ss:$8 sps:$4 sm:$0xff]   ;;  %v1048_v23 = vld [vmem:[#allocation2] ss:$8 sps:$4 sm:$0xff]  }
  0x15   :  { %916 = vmatmul.mubr.msk.bf16.vlgmr.msra.gmra.mxu0 %vm54_vm1, %v35_v9  ;;  %322 = vmatpush1.bf16.msra.mxu1 %v1030_v11  ;;  %v1049_v24 = vld [vmem:[#allocation2 + $0xf4] ss:$8 sps:$4 sm:$0xff]   ;;  %v1051_v25 = vld [vmem:[#allocation2 + $0xf0] ss:$8 sps:$4 sm:$0xff]   ;;  %v1052_v26 = vld [vmem:[#allocation2 + $0xe4] ss:$8 sps:$4 sm:$0xff]  }
  0x16   :  { %323 = vmatprep.subr.bf16.mxu1 %v1031_v12  ;;  %v1054_v27 = vld [vmem:[#allocation2 + $0xe0] ss:$8 sps:$4 sm:$0xff]   ;;  %v1055_v28 = vld [vmem:[#allocation2 + $0xd4] ss:$8 sps:$4 sm:$0xff]   ;;  %v1057_v29 = vld [vmem:[#allocation2 + $0xd0] ss:$8 sps:$4 sm:$0xff]  }
  0x17   :  { %v1058_v30 = vld [vmem:[#allocation2 + $0xc4] ss:$8 sps:$4 sm:$0xff]   ;;  %v1060_v31 = vld [vmem:[#allocation2 + $0xc0] ss:$8 sps:$4 sm:$0xff]   ;;  %v1061_v32 = vld [vmem:[#allocation2 + $0xb4] ss:$8 sps:$4 sm:$0xff]  }
  0x18   :  { %v1063_v33 = vld [vmem:[#allocation2 + $0xb0] ss:$8 sps:$4 sm:$0xff]   ;;  %v1064_v34 = vld [vmem:[#allocation2 + $0xa4] ss:$8 sps:$4 sm:$0xff]   ;;  %v1066_v35 = vld [vmem:[#allocation2 + $0xa0] ss:$8 sps:$4 sm:$0xff]  }
  0x19   :  { %324 = vmatpush1.bf16.msra.mxu1 %v1033_v13  ;;  %v1067_v36 = vld [vmem:[#allocation2 + $0x94] ss:$8 sps:$4 sm:$0xff]   ;;  %v1069_v37 = vld [vmem:[#allocation2 + $0x90] ss:$8 sps:$4 sm:$0xff]   ;;  %v1070_v38 = vld [vmem:[#allocation2 + $0x84] ss:$8 sps:$4 sm:$0xff]  }
  0x1a   :  { %325 = vmatprep.subr.bf16.mxu1 %v1034_v14  ;;  %v1072_v39 = vld [vmem:[#allocation2 + $0x80] ss:$8 sps:$4 sm:$0xff]   ;;  %v1073_v40 = vld [vmem:[#allocation2 + $0x170] ss:$8 sps:$4 sm:$0xff]   ;;  %v1075_v41 = vld [vmem:[#allocation2 + $0x174] ss:$8 sps:$4 sm:$0xff]  }
  0x1b   :  { %v1078_v42 = vld [vmem:[#allocation2 + $0x164] ss:$8 sps:$4 sm:$0xff]   ;;  %574 = vmatprep.subr.bf16.mxu0 %v1075_v41  ;;  %v1076_v43 = vld [vmem:[#allocation2 + $0x160] ss:$8 sps:$4 sm:$0xff]   ;;  %v1081_v44 = vld [vmem:[#allocation2 + $0x154] ss:$8 sps:$4 sm:$0xff]  }
  0x1c   :  { %575 = vmatpush1.bf16.msra.mxu0 %v1073_v40  ;;  %v1079_v45 = vld [vmem:[#allocation2 + $0x150] ss:$8 sps:$4 sm:$0xff]   ;;  %v1084_v46 = vld [vmem:[#allocation2 + $0x144] ss:$8 sps:$4 sm:$0xff]   ;;  %v1082_v47 = vld [vmem:[#allocation2 + $0x140] ss:$8 sps:$4 sm:$0xff]  }
  0x1d   :  { %326 = vmatpush1.bf16.msra.mxu1 %v1036_v15  ;;  %576 = vmatprep.subr.bf16.mxu0 %v1078_v42  ;;  %v1087_v48 = vld [vmem:[#allocation2 + $0x134] ss:$8 sps:$4 sm:$0xff]   ;;  %v1085_v49 = vld [vmem:[#allocation2 + $0x130] ss:$8 sps:$4 sm:$0xff]   ;;  %v1090_v50 = vld [vmem:[#allocation2 + $0x124] ss:$8 sps:$4 sm:$0xff]  }
  0x1e   :  { %327 = vmatprep.subr.bf16.mxu1 %v1037_v16  ;;  %v1088_v51 = vld [vmem:[#allocation2 + $0x120] ss:$8 sps:$4 sm:$0xff]   ;;  %v1093_v52 = vld [vmem:[#allocation2 + $0x114] ss:$8 sps:$4 sm:$0xff]   ;;  %v1091_v53 = vld [vmem:[#allocation2 + $0x110] ss:$8 sps:$4 sm:$0xff]  }
  0x1f   :  { %v1096_v54 = vld [vmem:[#allocation2 + $0x104] ss:$8 sps:$4 sm:$0xff]   ;;  %v1094_v55 = vld [vmem:[#allocation2 + $0x100] ss:$8 sps:$4 sm:$0xff]   ;;  %v1099_v56 = vld [vmem:[#allocation2 + $0x1f4] ss:$8 sps:$4 sm:$0xff]  }
  0x20   :  { %577 = vmatpush1.bf16.msra.mxu0 %v1076_v43  ;;  %v1097_v57 = vld [vmem:[#allocation2 + $0x1f0] ss:$8 sps:$4 sm:$0xff]   ;;  %v1102_v58 = vld [vmem:[#allocation2 + $0x1e4] ss:$8 sps:$4 sm:$0xff]   ;;  %v1100_v59 = vld [vmem:[#allocation2 + $0x1e0] ss:$8 sps:$4 sm:$0xff]  }
  0x21   :  { %328 = vmatpush1.bf16.msra.mxu1 %v1039_v17  ;;  %578 = vmatprep.subr.bf16.mxu0 %v1081_v44  ;;  %v1105_v60 = vld [vmem:[#allocation2 + $0x1d4] ss:$8 sps:$4 sm:$0xff]   ;;  %v1103_v61 = vld [vmem:[#allocation2 + $0x1d0] ss:$8 sps:$4 sm:$0xff]   ;;  %v1108_v62 = vld [vmem:[#allocation2 + $0x1c4] ss:$8 sps:$4 sm:$0xff]  }
  0x22   :  { %329 = vmatprep.subr.bf16.mxu1 %v1040_v18  ;;  %v1106_v63 = vld [vmem:[#allocation2 + $0x1c0] ss:$8 sps:$4 sm:$0xff]   ;;  %v1111_v0 = vld [vmem:[#allocation2 + $0x1b4] ss:$8 sps:$4 sm:$0xff]   ;;  %v1109_v1 = vld [vmem:[#allocation2 + $0x1b0] ss:$8 sps:$4 sm:$0xff]  }
  0x23   :  { %v40_v3 = vshrl.u32 %v39_v2, 7  ;;  %v37_v6 = vld [vmem:[%s1303_s3] sm:$0x3]  ;;  %v1141_v41 = vld [vmem:[#allocation2 + $0x214] ss:$8 sps:$4 sm:$0xff]  }
  0x24   :  { %579 = vmatpush1.bf16.msra.mxu0 %v1079_v45  ;;  %v1136_v40 = vld [vmem:[#allocation2 + $0x220] ss:$8 sps:$4 sm:$0xff]   ;;  %v1139_v42 = vld [vmem:[#allocation2 + $0x210] ss:$8 sps:$4 sm:$0xff]   ;;  %v1144_v43 = vld [vmem:[#allocation2 + $0x204] ss:$8 sps:$4 sm:$0xff]  }
  0x25   :  { %330 = vmatpush1.bf16.msra.mxu1 %v1042_v19  ;;  %580 = vmatprep.subr.bf16.mxu0 %v1084_v46  ;;  %v1273_v4 = vsub.s32 1, %v40_v3  ;;  %v1275_v5 = vsub.s32 0, %v40_v3  ;;  %v1142_v44 = vld [vmem:[#allocation2 + $0x200] ss:$8 sps:$4 sm:$0xff]   ;;  %v1147_v45 = vld [vmem:[#allocation2 + $0x2f4] ss:$8 sps:$4 sm:$0xff]  }
  0x26   :  { %331 = vmatprep.subr.bf16.mxu1 %v1043_v20  ;;  %v1145_v46 = vld [vmem:[#allocation2 + $0x2f0] ss:$8 sps:$4 sm:$0xff]  }
  0x27   :  { %v46_v8 = vrot.slane %v37_v6, %v1273_v4  ;;  %v42_v9 = vrot.slane %v37_v6, %v1275_v5 }
  0x28   :  { %581 = vmatpush1.bf16.msra.mxu0 %v1082_v47  ;;  %v1150_v47 = vld [vmem:[#allocation2 + $0x2e4] ss:$8 sps:$4 sm:$0xff]  }
  0x29   :  { %332 = vmatpush1.bf16.msra.mxu1 %v1045_v21  ;;  %582 = vmatprep.subr.bf16.mxu0 %v1087_v48  ;;  %v1148_v48 = vld [vmem:[#allocation2 + $0x2e0] ss:$8 sps:$4 sm:$0xff]  }
  0x2a   :  { %333 = vmatprep.subr.bf16.mxu1 %v1046_v22 }
  0x2c   :  { %583 = vmatpush1.bf16.msra.mxu0 %v1085_v49  ;;  %v1153_v49 = vld [vmem:[#allocation2 + $0x2d4] ss:$8 sps:$4 sm:$0xff]  }
  0x2d   :  { %334 = vmatpush1.bf16.msra.mxu1 %v1048_v23  ;;  %584 = vmatprep.subr.bf16.mxu0 %v1090_v50  ;;  %v1114_v23 = vld [vmem:[#allocation2 + $0x1a4] ss:$8 sps:$4 sm:$0xff]   ;;  %v1151_v50 = vld [vmem:[#allocation2 + $0x2d0] ss:$8 sps:$4 sm:$0xff]  }
  0x2e   :  { %335 = vmatprep.subr.bf16.mxu1 %v1049_v24  ;;  %v1112_v24 = vld [vmem:[#allocation2 + $0x1a0] ss:$8 sps:$4 sm:$0xff]  }
  0x30   :  { %585 = vmatpush1.bf16.msra.mxu0 %v1088_v51  ;;  %v1156_v51 = vld [vmem:[#allocation2 + $0x2c4] ss:$8 sps:$4 sm:$0xff]  }
  0x31   :  { %336 = vmatpush2.bf16.msra.mxu1 %v1051_v25  ;;  %586 = vmatprep.subr.bf16.mxu0 %v1093_v52  ;;  %v1117_v25 = vld [vmem:[#allocation2 + $0x194] ss:$8 sps:$4 sm:$0xff]   ;;  %v1154_v52 = vld [vmem:[#allocation2 + $0x2c0] ss:$8 sps:$4 sm:$0xff]  }
  0x32   :  { %337 = vmatprep.subr.bf16.mxu1 %v1052_v26  ;;  %v1115_v26 = vld [vmem:[#allocation2 + $0x190] ss:$8 sps:$4 sm:$0xff]  }
  0x34   :  { %587 = vmatpush1.bf16.msra.mxu0 %v1091_v53  ;;  %v1159_v53 = vld [vmem:[#allocation2 + $0x2b4] ss:$8 sps:$4 sm:$0xff]  }
  0x35   :  { %338 = vmatpush2.bf16.msra.mxu1 %v1054_v27  ;;  %588 = vmatprep.subr.bf16.mxu0 %v1096_v54  ;;  %v1120_v27 = vld [vmem:[#allocation2 + $0x184] ss:$8 sps:$4 sm:$0xff]   ;;  %v1157_v54 = vld [vmem:[#allocation2 + $0x2b0] ss:$8 sps:$4 sm:$0xff]  }
  0x36   :  { %339 = vmatprep.subr.bf16.mxu1 %v1055_v28  ;;  %v1118_v28 = vld [vmem:[#allocation2 + $0x180] ss:$8 sps:$4 sm:$0xff]  }
  0x38   :  { %589 = vmatpush1.bf16.msra.mxu0 %v1094_v55  ;;  %v917_v55 = vld [vmem:[%s1303_s3 + $0x2] sm:$0x3] }
  0x39   :  { %340 = vmatpush2.bf16.msra.mxu1 %v1057_v29  ;;  %590 = vmatprep.subr.bf16.mxu0 %v1099_v56  ;;  %v1121_v29 = vld [vmem:[#allocation2 + $0x270] ss:$8 sps:$4 sm:$0xff]  }
  0x3a   :  { %341 = vmatprep.subr.bf16.mxu1 %v1058_v30  ;;  %v1123_v30 = vld [vmem:[#allocation2 + $0x274] ss:$8 sps:$4 sm:$0xff]  }
  0x3c   :  { %591 = vmatpush2.bf16.msra.mxu0 %v1097_v57  ;;  %v156_v57 = vrot.slane %v917_v55, %v1273_v4 }
  0x3d   :  { %342 = vmatpush2.bf16.msra.mxu1 %v1060_v31  ;;  %592 = vmatprep.subr.bf16.mxu0 %v1102_v58  ;;  %v1126_v31 = vld [vmem:[#allocation2 + $0x264] ss:$8 sps:$4 sm:$0xff]   ;;  %v152_v58 = vrot.slane %v917_v55, %v1275_v5 }
  0x3e   :  { %343 = vmatprep.subr.bf16.mxu1 %v1061_v32  ;;  %v1124_v32 = vld [vmem:[#allocation2 + $0x260] ss:$8 sps:$4 sm:$0xff]  }
  0x40   :  { %593 = vmatpush2.bf16.msra.mxu0 %v1100_v59 }
  0x41   :  { %344 = vmatpush2.bf16.msra.mxu1 %v1063_v33  ;;  %594 = vmatprep.subr.bf16.mxu0 %v1105_v60  ;;  %v1129_v33 = vld [vmem:[#allocation2 + $0x254] ss:$8 sps:$4 sm:$0xff]  }
  0x42   :  { %345 = vmatprep.subr.bf16.mxu1 %v1064_v34  ;;  %v1127_v34 = vld [vmem:[#allocation2 + $0x250] ss:$8 sps:$4 sm:$0xff]  }
  0x44   :  { %595 = vmatpush2.bf16.msra.mxu0 %v1103_v61 }
  0x45   :  { %346 = vmatpush2.bf16.msra.mxu1 %v1066_v35  ;;  %596 = vmatprep.subr.bf16.mxu0 %v1108_v62  ;;  %v1132_v35 = vld [vmem:[#allocation2 + $0x244] ss:$8 sps:$4 sm:$0xff]  }
  0x46   :  { %347 = vmatprep.subr.bf16.mxu1 %v1067_v36  ;;  %v1130_v36 = vld [vmem:[#allocation2 + $0x240] ss:$8 sps:$4 sm:$0xff]  }
  0x48   :  { %597 = vmatpush2.bf16.msra.mxu0 %v1106_v63 }
  0x49   :  { %348 = vmatpush2.bf16.msra.mxu1 %v1069_v37  ;;  %598 = vmatprep.subr.bf16.mxu0 %v1111_v0  ;;  %v1135_v37 = vld [vmem:[#allocation2 + $0x234] ss:$8 sps:$4 sm:$0xff]  }
  0x4a   :  { %349 = vmatprep.subr.bf16.mxu1 %v1070_v38  ;;  %v1133_v38 = vld [vmem:[#allocation2 + $0x230] ss:$8 sps:$4 sm:$0xff]  }
  0x4c   :  { %599 = vmatpush2.bf16.msra.mxu0 %v1109_v1 }
  0x4d   :  { %350 = vmatpush2.bf16.msra.mxu1 %v1072_v39  ;;  %600 = vmatprep.subr.bf16.mxu0 %v1114_v23  ;;  %v1138_v39 = vld [vmem:[#allocation2 + $0x224] ss:$8 sps:$4 sm:$0xff]  }
  0x4e   :  { %829 = vmatprep.subr.bf16.mxu1 %v1123_v30 }
  0x50   :  { %601 = vmatpush2.bf16.msra.mxu0 %v1112_v24 }
  0x51   :  { %602 = vmatprep.subr.bf16.mxu0 %v1117_v25 }
  0x54   :  { %603 = vmatpush2.bf16.msra.mxu0 %v1115_v26 }
  0x55   :  { %604 = vmatprep.subr.bf16.mxu0 %v1120_v27 }
  0x58   :  { %605 = vmatpush2.bf16.msra.mxu0 %v1118_v28 }
  0xd5   :  { %v99_v7 = vpop.f32.mrf.mxu0 }
  0xd6   :  { %v100_v14 = vadd.f32 %v99_v7, %v42_v9 }
  0xd7   :  { %v101_v10 = vpop.f32.mrf.mxu0 }
  0xd8   :  { %v102_v12 = vadd.f32 %v101_v10, %v46_v8  ;;  %v108_v20 = vmax.f32 %v100_v14, 0.0  ;;  %v1162_v10 = vld [vmem:[#allocation2 + $0x2a4] ss:$8 sps:$4 sm:$0xff]  }
  0xd9   :  { %v103_v11 = vpop.f32.mrf.mxu0  ;;  %v1168_v14 = vld [vmem:[#allocation2 + $0x284] ss:$8 sps:$4 sm:$0xff]  }
  0xda   :  { %v104_v13 = vadd.f32 %v103_v11, %v42_v9  ;;  %v109_v18 = vmax.f32 %v102_v12, 0.0  ;;  %v1160_v11 = vld [vmem:[#allocation2 + $0x2a0] ss:$8 sps:$4 sm:$0xff]   ;;  %v1165_v12 = vld [vmem:[#allocation2 + $0x294] ss:$8 sps:$4 sm:$0xff]  }
  0xdb   :  { %v105_v15 = vpop.f32.mrf.mxu0 }
  0xdc   :  { %v106_v16 = vadd.f32 %v105_v15, %v46_v8  ;;  %v110_v17 = vmax.f32 %v104_v13, 0.0  ;;  %v1163_v13 = vld [vmem:[#allocation2 + $0x290] ss:$8 sps:$4 sm:$0xff]   ;;  %v1166_v15 = vld [vmem:[#allocation2 + $0x280] ss:$8 sps:$4 sm:$0xff]  }
  0xde   :  { %v111_v19 = vmax.f32 %v106_v16, 0.0  ;;  %v112_v22 = vpack.c.bf16 %v110_v17, %v108_v20  ;;  %v950_v16 = vld [vmem:[%s1303_s3 + $0x4] sm:$0x3] }
  0xe0   :  { %v113_v21 = vpack.c.bf16 %v111_v19, %v109_v18  ;;  %v411_v18 = vrot.slane %v950_v16, %v1273_v4  ;;  %v407_v19 = vrot.slane %v950_v16, %v1275_v5 }
  0xe2   :  { %351 = vmatprep.mubr.bf16.mxu1 %v113_v21 }
  0xe3   :  { %352 = vmatmul.mubr.bf16.vlgmr.msra.gmra.mxu1 %v112_v22 }
  0xe4   :  { %830 = vmatpush1.bf16.msra.mxu1 %v1121_v29 }
  0xe5   :  { %831 = vmatprep.subr.bf16.mxu1 %v1126_v31 }
  0xe8   :  { %832 = vmatpush1.bf16.msra.mxu1 %v1124_v32 }
  0xe9   :  { %833 = vmatprep.subr.bf16.mxu1 %v1129_v33  ;;  %v983_v33 = vld [vmem:[%s1303_s3 + $0x6] sm:$0x3]  ;;  %s1233_s3 = smov [#allocation5]  }
  0xea   :  { %s901_s7 = sshll.u32 %s1233_s3, 4  ;;  %s902_s7 = int_to_ptr.vmem [resolvable:$true] %s901_s7 }
  0xeb   :  { %s1205_s8 = scalar_lea.vmem %s902_s7, 512  ;;  %p1210_p6 = scmp.lt.s32.totalorder %s902_s7, %s902_s7 }
  0xec   :  { %834 = vmatpush1.bf16.msra.mxu1 %v1127_v34  ;;  %v662_v34 = vrot.slane %v983_v33, %v1275_v5  ;;  %p1206_p5 = scmp.ne.s32.totalorder %s902_s7, %s1205_s8  ;;  %p1211_p7 = scmp.lt.s32.totalorder %s1205_s8, %s1205_s8 }
  0xed   :  { %835 = vmatprep.subr.bf16.mxu1 %v1132_v35  ;;  %v666_v35 = vrot.slane %v983_v33, %v1273_v4 }
  0xee   :  { %p1212_p8 = por %p1211_p7, %p1210_p6 }
  0xf0   :  { %836 = vmatpush1.bf16.msra.mxu1 %v1130_v36  ;;  %p1213_p9 = pnand %p1212_p8, %p1206_p5 }
  0xf1   :  { %837 = vmatprep.subr.bf16.mxu1 %v1135_v37 }
  0xf4   :  { %838 = vmatpush1.bf16.msra.mxu1 %v1133_v38 }
  0xf5   :  { %839 = vmatprep.subr.bf16.mxu1 %v1138_v39 }
  0xf8   :  { %840 = vmatpush1.bf16.msra.mxu1 %v1136_v40 }
  0xf9   :  { %841 = vmatprep.subr.bf16.mxu1 %v1141_v41 }
  0xfc   :  { %842 = vmatpush1.bf16.msra.mxu1 %v1139_v42 }
  0xfd   :  { %843 = vmatprep.subr.bf16.mxu1 %v1144_v43 }
 0x100   :  { %844 = vmatpush1.bf16.msra.mxu1 %v1142_v44 }
 0x101   :  { %845 = vmatprep.subr.bf16.mxu1 %v1147_v45 }
 0x104   :  { %846 = vmatpush2.bf16.msra.mxu1 %v1145_v46 }
 0x105   :  { %847 = vmatprep.subr.bf16.mxu1 %v1150_v47 }
 0x108   :  { %848 = vmatpush2.bf16.msra.mxu1 %v1148_v48 }
 0x109   :  { %849 = vmatprep.subr.bf16.mxu1 %v1153_v49 }
 0x10c   :  { %850 = vmatpush2.bf16.msra.mxu1 %v1151_v50 }
 0x10d   :  { %851 = vmatprep.subr.bf16.mxu1 %v1156_v51 }
 0x110   :  { %852 = vmatpush2.bf16.msra.mxu1 %v1154_v52 }
 0x111   :  { %853 = vmatprep.subr.bf16.mxu1 %v1159_v53 }
 0x114   :  { %854 = vmatpush2.bf16.msra.mxu1 %v1157_v54 }
 0x115   :  { %855 = vmatprep.subr.bf16.mxu1 %v1162_v10 }
 0x118   :  { %856 = vmatpush2.bf16.msra.mxu1 %v1160_v11 }
 0x119   :  { %857 = vmatprep.subr.bf16.mxu1 %v1165_v12 }
 0x11c   :  { %858 = vmatpush2.bf16.msra.mxu1 %v1163_v13 }
 0x11d   :  { %859 = vmatprep.subr.bf16.mxu1 %v1168_v14 }
 0x120   :  { %860 = vmatpush2.bf16.msra.mxu1 %v1166_v15 }
 0x1a3   :  { %v353_v56 = vpop.f32.mrf.mxu1 }
 0x1a4   :  { %v354_v63 = vadd.f32 %v353_v56, %v152_v58 }
 0x1a5   :  { %v355_v59 = vpop.f32.mrf.mxu1 }
 0x1a6   :  { %v356_v61 = vadd.f32 %v355_v59, %v156_v57  ;;  %v362_v7 = vmax.f32 %v354_v63, 0.0 }
 0x1a7   :  { %v357_v60 = vpop.f32.mrf.mxu1 }
 0x1a8   :  { %v358_v62 = vadd.f32 %v357_v60, %v152_v58  ;;  %v363_v3 = vmax.f32 %v356_v61, 0.0 }
 0x1a9   :  { %v359_v0 = vpop.f32.mrf.mxu1 }
 0x1aa   :  { %v360_v1 = vadd.f32 %v359_v0, %v156_v57  ;;  %v364_v2 = vmax.f32 %v358_v62, 0.0 }
 0x1ac   :  { %v365_v6 = vmax.f32 %v360_v1, 0.0  ;;  %v366_v9 = vpack.c.bf16 %v364_v2, %v362_v7 }
 0x1ae   :  { %v367_v8 = vpack.c.bf16 %v365_v6, %v363_v3 }
 0x1b0   :  { %606 = vmatprep.mubr.bf16.mxu0 %v367_v8 }
 0x1b1   :  { %607 = vmatmul.mubr.bf16.vlgmr.msra.gmra.mxu0 %v366_v9 }
 0x271   :  { %v608_v17 = vpop.f32.mrf.mxu0 }
 0x272   :  { %v609_v24 = vadd.f32 %v608_v17, %v407_v19 }
 0x273   :  { %v610_v20 = vpop.f32.mrf.mxu0 }
 0x274   :  { %v611_v22 = vadd.f32 %v610_v20, %v411_v18  ;;  %v617_v30 = vmax.f32 %v609_v24, 0.0 }
 0x275   :  { %v612_v21 = vpop.f32.mrf.mxu0 }
 0x276   :  { %v613_v23 = vadd.f32 %v612_v21, %v407_v19  ;;  %v618_v28 = vmax.f32 %v611_v22, 0.0 }
 0x277   :  { %v614_v25 = vpop.f32.mrf.mxu0 }
 0x278   :  { %v615_v26 = vadd.f32 %v614_v25, %v411_v18  ;;  %v619_v27 = vmax.f32 %v613_v23, 0.0 }
 0x27a   :  { %v620_v29 = vmax.f32 %v615_v26, 0.0  ;;  %v621_v32 = vpack.c.bf16 %v619_v27, %v617_v30 }
 0x27c   :  { %v622_v31 = vpack.c.bf16 %v620_v29, %v618_v28 }
 0x27e   :  { %861 = vmatprep.mubr.bf16.mxu1 %v622_v31 }
 0x27f   :  { %862 = vmatmul.mubr.bf16.vlgmr.msra.gmra.mxu1 %v621_v32 }
 0x33f   :  { %v863_v36 = vpop.f32.mrf.mxu1 }
 0x340   :  { %v864_v37 = vadd.f32 %v863_v36, %v662_v34 }
 0x341   :  { %v865_v38 = vpop.f32.mrf.mxu1 }
 0x342   :  { %v872_v39 = vsub.f32 0.0, %v864_v37  ;;  %v866_v40 = vadd.f32 %v865_v38, %v666_v35 }
 0x343   :  { %v867_v41 = vpop.f32.mrf.mxu1 }
 0x344   :  { %v876_v42 = vmul.f32 1.442695, %v872_v39  ;;  %v873_v43 = vsub.f32 0.0, %v866_v40  ;;  %v868_v44 = vadd.f32 %v867_v41, %v662_v34 }
 0x345   :  { %v869_v45 = vpop.f32.mrf.mxu1 }
 0x346   :  { %1169 = vpow2.f32 %v876_v42  ;;  %v878_v46 = vmul.f32 1.442695, %v873_v43  ;;  %v874_v47 = vsub.f32 0.0, %v868_v44  ;;  %v870_v48 = vadd.f32 %v869_v45, %v666_v35 }
 0x348   :  { %1171 = vpow2.f32 %v878_v46  ;;  %v880_v49 = vmul.f32 1.442695, %v874_v47  ;;  %v875_v50 = vsub.f32 0.0, %v870_v48 }
 0x34a   :  { %1173 = vpow2.f32 %v880_v49  ;;  %v882_v5 = vmul.f32 1.442695, %v875_v50 }
 0x34c   :  { %1175 = vpow2.f32 %v882_v5 }
 0x353   :  { %v1170_v4 = vpop.eup %1169 }
 0x354   :  { %v884_v51 = vadd.f32 1.0, %v1170_v4 }
 0x355   :  { %v1172_v52 = vpop.eup %1171 }
 0x356   :  { %1177 = vrcp.f32 %v884_v51  ;;  %v885_v53 = vadd.f32 1.0, %v1172_v52 }
 0x357   :  { %v1174_v54 = vpop.eup %1173 }
 0x358   :  { %1179 = vrcp.f32 %v885_v53  ;;  %v886_v55 = vadd.f32 1.0, %v1174_v54 }
 0x359   :  { %v1176_v56 = vpop.eup %1175 }
 0x35a   :  { %1181 = vrcp.f32 %v886_v55  ;;  %v887_v57 = vadd.f32 1.0, %v1176_v56 }
 0x35c   :  { %1183 = vrcp.f32 %v887_v57 }
 0x363   :  { %v1178_v58 = vpop.eup %1177 }
 0x364   :  { %892 = vst [vmem:[#allocation5] sm:$0xff] %v1178_v58 }
 0x365   :  { %v1180_v59 = vpop.eup %1179 }
 0x366   :  { %893 = vst [vmem:[#allocation5 + $0x8] sm:$0xff] %v1180_v59 }
 0x367   :  { %v1182_v60 = vpop.eup %1181 }
 0x368   :  { %894 = vst [vmem:[#allocation5 + $0x10] sm:$0xff] %v1182_v60 }
 0x369   :  { %v1184_v61 = vpop.eup %1183 }
 0x36a   :  { %895 = vst [vmem:[#allocation5 + $0x18] sm:$0xff] %v1184_v61 }
 0x36b   :  { %1216 = shalt.err (!%p1213_p9)
}
 0x36c   :  { %s1234_s9 = smov 256   ;;  %s1235_s10 = smov 16  }
 0x36d   :  { %907 = dma.vmem_to_hbm [thread:$0]  %s902_s7, 512, %s1304_s4, [#allocation4], %s1234_s9, %s1234_s9, %s1235_s10  }
 0x36e   :  { %1227 = dma.done.wait [#allocation4], 512  }
 0x36f   :  { %1228 = vsyncadd [#allocation4], 4294966784 }
 0x370   :  { %911 = vsyncpa [#allocation3], 1 }
 0x371   :  { %912 = vsyncpa [#allocation4], 1 }

</bundles_post_ra>
